<compile_context>
chip_gen: v5e
topology: v5e:2x2
jax: 0.10.0
libtpu: 0.0.40
codegen_flags: <defaults>
</compile_context>

<pallas_src>
import functools

import jax
import jax.numpy as jnp
from jax.experimental import pallas as pl
from jax.experimental.pallas import tpu as pltpu


def _local_dict_loss_kernel(A_ref, asq_ref, y_ref, x_ref, out_ref, *,
                            penalty, n_total, tile_n, tiles_per_split,
                            total_tiles, has_ragged, has_overshoot,
                            matmul_in_bf16):
    c = pl.program_id(0)            # TensorCore split ("parallel")
    t = pl.program_id(1)            # N-tile within the split ("arbitrary")
    g = c * tiles_per_split + t     # global tile index

    @pl.when(t == 0)
    def _init():
        out_ref[...] = jnp.zeros_like(out_ref)

    def accumulate(y_nat, x_nat):
        A = A_ref[...]
        if matmul_in_bf16 and y_nat.dtype == jnp.float32:
            x_mm = x_nat.astype(jnp.bfloat16)
            A_mm = A.astype(jnp.bfloat16)
        else:
            x_mm, A_mm = x_nat, A
        # The single big MXU matmul per tile.
        recon = jnp.dot(x_mm, A_mm, preferred_element_type=jnp.float32)

        y = y_nat.astype(jnp.float32)
        x = x_nat.astype(jnp.float32)

        # Fused loss (asq_ref already holds penalty * ||A_k||^2):
        #   sum_d[(0.5 + p*xr)*y^2 + 0.5*recon^2 - (1+2p)*y*recon]
        # + sum_k[x * p*||A_k||^2]
        xr = jnp.sum(x, axis=1, keepdims=True)                       # (tile_n,1)
        coef = 0.5 + penalty * xr
        e_d = (coef * (y * y)
               + 0.5 * (recon * recon)
               - (1.0 + 2.0 * penalty) * (y * recon))                # (tile_n,D)
        d_rows = jnp.sum(e_d, axis=1, keepdims=True)                 # (tile_n,1)
        k_rows = jnp.sum(x * asq_ref[...], axis=1, keepdims=True)    # (tile_n,1)
        # (1,1) partial broadcast-accumulated into the lane-dense (8,128) block;
        # the wrapper undoes the broadcast and applies 1/N.
        out_ref[...] += jnp.sum(d_rows + k_rows, keepdims=True)

    if not has_ragged and not has_overshoot:
        # Steady state: no masking, no branching.
        accumulate(y_ref[...], x_ref[...])
    else:
        in_range = g < total_tiles
        if has_ragged:
            is_ragged = g == (total_tiles - 1)

            @pl.when(in_range & jnp.logical_not(is_ragged))
            def _steady():
                accumulate(y_ref[...], x_ref[...])

            @pl.when(is_ragged)
            def _ragged():
                row_ids = (jax.lax.broadcasted_iota(jnp.int32, (tile_n, 1), 0)
                           + g * tile_n)
                valid = row_ids < n_total
                # Mask before any multiply so padded/garbage rows stay inert.
                accumulate(jnp.where(valid, y_ref[...], 0),
                           jnp.where(valid, x_ref[...], 0))
        else:
            @pl.when(in_range)   # skip overshoot tiles entirely
            def _steady():
                accumulate(y_ref[...], x_ref[...])


def _auto_tile_n(N, K, D, y_dtype, x_dtype, A_dtype,
                 budget=20 * 1024 * 1024):
    """Largest tile_n whose double-buffered y/x tiles + resident A fit budget."""
    per_row = 2 * (D * jnp.dtype(y_dtype).itemsize
                   + K * jnp.dtype(x_dtype).itemsize)
    fixed = (2 * K * D * jnp.dtype(A_dtype).itemsize   # A (pipeline buffers)
             + 2 * 128 * 4                             # penalty*||A_k||^2
             + 2 * 8 * 128 * 4)                        # output block
    for cand in (2048, 1024, 512, 256, 128, 64, 32, 16, 8):
        if fixed + cand * per_row <= budget:
            return cand
    return 8


def local_dictionary_loss(A, y, x, penalty, *, tile_n=None, num_splits=None,
                          matmul_in_bf16=False):
    """Pallas equivalent of LocalDictionaryLoss(penalty).forward(A, y, x)."""
    K, D = A.shape
    N, D2 = y.shape
    assert D == D2 and x.shape == (N, K)

    # Megacore split only where a second TensorCore exists (v7x).
    if num_splits is None:
        try:
            kind = jax.devices()[0].device_kind.lower()
        except Exception:
            kind = ""
        num_splits = 2 if ("v7" in kind or "7x" in kind) else 1

    if tile_n is None:
        tile_n = _auto_tile_n(N, K, D, y.dtype, x.dtype, A.dtype)
    tile_n = min(tile_n, N)
    if tile_n != N:
        tile_n = max(8, (tile_n // 8) * 8)   # f32 sublane multiple
    total_tiles = pl.cdiv(N, tile_n)

    num_splits = max(1, min(num_splits, total_tiles))
    tiles_per_split = pl.cdiv(total_tiles, num_splits)
    last_tile = total_tiles - 1
    has_ragged = (N % tile_n) != 0
    has_overshoot = num_splits * tiles_per_split != total_tiles

    # penalty * ||A_k||^2, computed once in XLA (tiny) and streamed in.
    A32 = A.astype(jnp.float32)
    asq = (float(penalty) * jnp.sum(A32 * A32, axis=1))[None, :]   # (1, K)

    def row_block(c, t):
        # Clamp overshoot tiles of the last split; their compute is skipped.
        return (jnp.minimum(c * tiles_per_split + t, last_tile), 0)

    kernel = functools.partial(
        _local_dict_loss_kernel,
        penalty=float(penalty), n_total=N, tile_n=tile_n,
        tiles_per_split=tiles_per_split, total_tiles=total_tiles,
        has_ragged=has_ragged, has_overshoot=has_overshoot,
        matmul_in_bf16=matmul_in_bf16)

    # Explicit VMEM budget so the kernel is portable to v7x (64 MiB physical).
    est = (2 * tile_n * (D * jnp.dtype(y.dtype).itemsize
                         + K * jnp.dtype(x.dtype).itemsize)
           + 2 * K * D * jnp.dtype(A.dtype).itemsize
           + 2 * 128 * 4 + 2 * 8 * 128 * 4)
    vmem_limit = int(min(64 << 20, max(32 << 20, 2 * est)))

    partials = pl.pallas_call(
        kernel,
        out_shape=jax.ShapeDtypeStruct((num_splits * 8, 128), jnp.float32),
        grid_spec=pltpu.PrefetchScalarGridSpec(
            num_scalar_prefetch=0,
            grid=(num_splits, tiles_per_split),
            in_specs=[
                pl.BlockSpec((K, D), lambda c, t: (0, 0)),   # A (resident)
                pl.BlockSpec((1, K), lambda c, t: (0, 0)),   # penalty*||A_k||^2
                pl.BlockSpec((tile_n, D), row_block),        # y tile (streamed)
                pl.BlockSpec((tile_n, K), row_block),        # x tile (streamed)
            ],
            out_specs=pl.BlockSpec((8, 128), lambda c, t: (c, 0)),
        ),
        compiler_params=pltpu.CompilerParams(
            dimension_semantics=("parallel", "arbitrary"),
            vmem_limit_bytes=vmem_limit),
        cost_estimate=pl.CostEstimate(
            flops=2 * N * K * D + 10 * N * D + 6 * N * K,
            transcendentals=0,
            bytes_accessed=int(N * D * jnp.dtype(y.dtype).itemsize
                               + N * K * jnp.dtype(x.dtype).itemsize
                               + K * D * jnp.dtype(A.dtype).itemsize)),
    )(A, asq, y, x)

    # Cross-split reduce, undo the (8,128) broadcast, apply the 1/N mean.
    return jnp.sum(partials) / (8 * 128 * N)


def _reference_loss(A, y, x, penalty):
    """Pure-JAX reference (literal translation of the PyTorch module)."""
    weight = jnp.sum((y[:, None, :] - A[None, :, :]) ** 2, axis=2)
    recon = jnp.dot(x, A, precision=jax.lax.Precision.HIGHEST)
    a = 0.5 * jnp.mean(jnp.sum((y - recon) ** 2, axis=1))
    b = jnp.mean(jnp.sum(weight * x, axis=1))
    return a + penalty * b


if __name__ == "__main__":
    key = jax.random.PRNGKey(0)

    # Case 1: small shapes consistent with the module (single tile, defaults).
    # Case 2: forces N-tiling, a ragged last tile, a 2-way split AND an
    #         overshoot tile (total_tiles=3, splits=2) regardless of chip.
    # Case 3: auto tile / split selection path at a moderate size.
    cases = [
        (8,   16,  32, 0.5,  {}),
        (700, 64, 128, 0.25, dict(tile_n=256, num_splits=2)),
        (512, 32, 256, 1.0,  {}),
    ]
    for (N, K, D, penalty, kw) in cases:
        kA, ky, kx, key = jax.random.split(key, 4)
        A = jax.random.normal(kA, (K, D), dtype=jnp.float32)
        y = jax.random.normal(ky, (N, D), dtype=jnp.float32)
        x = jax.random.normal(kx, (N, K), dtype=jnp.float32)

        loss = jax.block_until_ready(local_dictionary_loss(A, y, x, penalty, **kw))
        ref = _reference_loss(A, y, x, penalty)
        assert jnp.allclose(loss, ref, rtol=2e-3, atol=2e-3), \
            (N, K, D, float(loss), float(ref))

    print("KERNEL_OK")
</pallas_src>

<mosaic_0001>
module attributes {stable_mosaic.version = 11 : i64} {
  func.func @_local_dict_loss_kernel(%arg0: i32, %arg1: i32, %arg2: memref<16x32xf32, #tpu.memory_space<vmem>>, %arg3: memref<1x16xf32, #tpu.memory_space<vmem>>, %arg4: memref<8x32xf32, #tpu.memory_space<vmem>>, %arg5: memref<8x16xf32, #tpu.memory_space<vmem>>, %arg6: memref<8x128xf32, #tpu.memory_space<vmem>>) attributes {dimension_semantics = [#tpu.dimension_semantics<parallel>, #tpu.dimension_semantics<arbitrary>], iteration_bounds = array<i64: 1, 1>, scalar_prefetch = 0 : i64, scratch_operands = 0 : i64, tpu.core_type = #tpu.core_type<tc>, window_params = [{pipeline_mode = #tpu.pipeline_mode<synchronous>, transform_indices = @transform_0, window_bounds = array<i64: 16, 32>}, {pipeline_mode = #tpu.pipeline_mode<synchronous>, transform_indices = @transform_1, window_bounds = array<i64: 1, 16>}, {transform_indices = @transform_2, window_bounds = array<i64: 8, 32>}, {transform_indices = @transform_3, window_bounds = array<i64: 8, 16>}, {transform_indices = @transform_4, window_bounds = array<i64: 8, 128>}]} {
    %c0_i32 = arith.constant 0 : i32
    %0 = arith.cmpi eq, %arg1, %c0_i32 : i32
    %1 = arith.extui %0 : i1 to i32
    %c0_i32_0 = arith.constant 0 : i32
    %2 = arith.cmpi ne, %1, %c0_i32_0 : i32
    scf.if %2 {
      %cst_20 = arith.constant 0.000000e+00 : f32
      %41 = vector.broadcast %cst_20 : f32 to vector<8x128xf32>
      %c0_21 = arith.constant 0 : index
      %c0_22 = arith.constant 0 : index
      %42 = vector.load %arg6[%c0_21, %c0_22] : memref<8x128xf32, #tpu.memory_space<vmem>>, vector<8x128xf32>
      tpu.vector_store %arg6[%c0_21, %c0_22], %41 {strides = array<i32>} : memref<8x128xf32, #tpu.memory_space<vmem>>, vector<8x128xf32>,
    } else {
    }
    %c0 = arith.constant 0 : index
    %c0_1 = arith.constant 0 : index
    %3 = vector.load %arg4[%c0, %c0_1] : memref<8x32xf32, #tpu.memory_space<vmem>>, vector<8x32xf32>
    %c0_2 = arith.constant 0 : index
    %c0_3 = arith.constant 0 : index
    %4 = vector.load %arg5[%c0_2, %c0_3] : memref<8x16xf32, #tpu.memory_space<vmem>>, vector<8x16xf32>
    %c0_4 = arith.constant 0 : index
    %c0_5 = arith.constant 0 : index
    %5 = vector.load %arg2[%c0_4, %c0_5] : memref<16x32xf32, #tpu.memory_space<vmem>>, vector<16x32xf32>
    %cst = arith.constant dense<0.000000e+00> : vector<8x32xf32>
    %6 = tpu.matmul %4, %5, %cst {dimension_numbers = #tpu.dot_dimension_numbers<[1], [0], [0], [1], [0, 0, 1, 1], [], []>} : vector<8x16xf32>, vector<16x32xf32>, vector<8x32xf32> -> vector<8x32xf32>
    %cst_6 = arith.constant dense<0.000000e+00> : vector<8xf32>
    %7 = vector.multi_reduction <add>, %4, %cst_6 [1] : vector<8x16xf32> to vector<8xf32>
    %8 = vector.shape_cast %7 : vector<8xf32> to vector<8x1xf32>
    %cst_7 = arith.constant 5.000000e-01 : f32
    %9 = vector.broadcast %cst_7 : f32 to vector<8x1xf32>
    %10 = arith.mulf %9, %8 : vector<8x1xf32>
    %cst_8 = arith.constant 5.000000e-01 : f32
    %11 = vector.broadcast %cst_8 : f32 to vector<8x1xf32>
    %12 = arith.addf %11, %10 : vector<8x1xf32>
    %13 = arith.mulf %3, %3 : vector<8x32xf32>
    %14 = vector.broadcast %12 : vector<8x1xf32> to vector<8x32xf32>
    %15 = arith.mulf %14, %13 : vector<8x32xf32>
    %16 = arith.mulf %6, %6 : vector<8x32xf32>
    %cst_9 = arith.constant 5.000000e-01 : f32
    %17 = vector.broadcast %cst_9 : f32 to vector<8x32xf32>
    %18 = arith.mulf %17, %16 : vector<8x32xf32>
    %19 = arith.addf %15, %18 : vector<8x32xf32>
    %20 = arith.mulf %3, %6 : vector<8x32xf32>
    %cst_10 = arith.constant 2.000000e+00 : f32
    %21 = vector.broadcast %cst_10 : f32 to vector<8x32xf32>
    %22 = arith.mulf %21, %20 : vector<8x32xf32>
    %23 = arith.subf %19, %22 : vector<8x32xf32>
    %cst_11 = arith.constant dense<0.000000e+00> : vector<8xf32>
    %24 = vector.multi_reduction <add>, %23, %cst_11 [1] : vector<8x32xf32> to vector<8xf32>
    %25 = vector.shape_cast %24 : vector<8xf32> to vector<8x1xf32>
    %c0_12 = arith.constant 0 : index
    %c0_13 = arith.constant 0 : index
    %26 = vector.load %arg3[%c0_12, %c0_13] : memref<1x16xf32, #tpu.memory_space<vmem>>, vector<1x16xf32>
    %27 = vector.broadcast %26 : vector<1x16xf32> to vector<8x16xf32>
    %28 = arith.mulf %4, %27 : vector<8x16xf32>
    %cst_14 = arith.constant dense<0.000000e+00> : vector<8xf32>
    %29 = vector.multi_reduction <add>, %28, %cst_14 [1] : vector<8x16xf32> to vector<8xf32>
    %30 = vector.shape_cast %29 : vector<8xf32> to vector<8x1xf32>
    %c0_15 = arith.constant 0 : index
    %c0_16 = arith.constant 0 : index
    %31 = vector.load %arg6[%c0_15, %c0_16] : memref<8x128xf32, #tpu.memory_space<vmem>>, vector<8x128xf32>
    %32 = arith.addf %25, %30 : vector<8x1xf32>
    %33 = vector.shape_cast %32 : vector<8x1xf32> to vector<1x8x1xf32>
    %cst_17 = arith.constant dense<0.000000e+00> : vector<1xf32>
    %34 = vector.multi_reduction <add>, %33, %cst_17 [1, 2] : vector<1x8x1xf32> to vector<1xf32>
    %35 = vector.shape_cast %34 : vector<1xf32> to vector<1x1x1xf32>
    %36 = vector.extract %35[0, 0, 0] : f32 from vector<1x1x1xf32>
    %37 = vector.broadcast %36 : f32 to vector<1x1xf32>
    %38 = vector.broadcast %37 : vector<1x1xf32> to vector<8x128xf32>
    %39 = arith.addf %31, %38 : vector<8x128xf32>
    %c0_18 = arith.constant 0 : index
    %c0_19 = arith.constant 0 : index
    %40 = vector.load %arg6[%c0_18, %c0_19] : memref<8x128xf32, #tpu.memory_space<vmem>>, vector<8x128xf32>
    tpu.vector_store %arg6[%c0_18, %c0_19], %39 {strides = array<i32>} : memref<8x128xf32, #tpu.memory_space<vmem>>, vector<8x128xf32>,
    return
  }
  func.func @transform_0(%arg0: i32, %arg1: i32) -> (i32, i32) {
    %c0_i32 = arith.constant 0 : i32
    %c0_i32_0 = arith.constant 0 : i32
    %c0_i32_1 = arith.constant 0 : i32
    return %c0_i32, %c0_i32_0 : i32, i32
  }
  func.func @transform_1(%arg0: i32, %arg1: i32) -> (i32, i32) {
    %c0_i32 = arith.constant 0 : i32
    %c0_i32_0 = arith.constant 0 : i32
    %c0_i32_1 = arith.constant 0 : i32
    return %c0_i32, %c0_i32_0 : i32, i32
  }
  func.func @transform_2(%arg0: i32, %arg1: i32) -> (i32, i32) {
    %c1_i32 = arith.constant 1 : i32
    %0 = arith.muli %arg0, %c1_i32 : i32
    %1 = arith.addi %0, %arg1 : i32
    %c0_i32 = arith.constant 0 : i32
    %2 = arith.minsi %1, %c0_i32 : i32
    %c0_i32_0 = arith.constant 0 : i32
    %c0_i32_1 = arith.constant 0 : i32
    return %2, %c0_i32_0 : i32, i32
  }
  func.func @transform_3(%arg0: i32, %arg1: i32) -> (i32, i32) {
    %c1_i32 = arith.constant 1 : i32
    %0 = arith.muli %arg0, %c1_i32 : i32
    %1 = arith.addi %0, %arg1 : i32
    %c0_i32 = arith.constant 0 : i32
    %2 = arith.minsi %1, %c0_i32 : i32
    %c0_i32_0 = arith.constant 0 : i32
    %c0_i32_1 = arith.constant 0 : i32
    return %2, %c0_i32_0 : i32, i32
  }
  func.func @transform_4(%arg0: i32, %arg1: i32) -> (i32, i32) {
    %c0_i32 = arith.constant 0 : i32
    %c0_i32_0 = arith.constant 0 : i32
    return %arg0, %c0_i32 : i32, i32
  }
}

</mosaic_0001>

<bundles_post_ra>
// kernel: tpu_custom_call.1
= control target key start
LH: loop header
LB: loop body
LE: loop exit
PB: predicated region body
PF: predicated region fallthrough
CT: control target
= control target key end

     0   :  { %9 = vsyncpa [#allocation3], 0  ;;  %s375_s0 = inlined_call_operand.hbm [shape: f32[16,32], index: 0, kind: input, shape index: {}]   ;;  %s376_s1 = inlined_call_operand.hbm [shape: f32[1,16], index: 1, kind: input, shape index: {}]   ;;  %s377_s2 = inlined_call_operand.hbm [shape: f32[8,32], index: 2, kind: input, shape index: {}]   ;;  %s378_s3 = inlined_call_operand.hbm [shape: f32[8,16], index: 3, kind: input, shape index: {}]   ;;  %s379_s4 = inlined_call_operand.hbm [shape: f32[8,128], index: 4, kind: output, shape index: {}]  }
   0x1   :  { %10 = vsyncpa [#allocation6], 0 }
   0x2   :  { %11 = vsyncpa [#allocation9], 0  ;;  %s31_s17 = sshll.u32 %s376_s1, 4  ;;  %s32_s17 = int_to_ptr.hbm [resolvable:$true] %s31_s17 }
   0x3   :  { %12 = vsyncpa [#allocation4], 0  ;;  %s328_s18 = smov [#allocation5]   ;;  %s17_s22 = sshll.u32 %s375_s0, 4  ;;  %s18_s22 = int_to_ptr.hbm [resolvable:$true] %s17_s22 }
   0x4   :  { %s33_s19 = sshll.u32 %s328_s18, 4  ;;  %s329_s23 = smov [#allocation2]   ;;  %s34_s19 = int_to_ptr.vmem [resolvable:$true] %s33_s19 }
   0x5   :  { %36 = dma.hbm_to_vmem [thread:$0]  %s32_s17, 16, %s34_s19, [#allocation6]  }
   0x6   :  { %s19_s24 = sshll.u32 %s329_s23, 4  ;;  %s330_s25 = smov 128   ;;  %s20_s24 = int_to_ptr.vmem [resolvable:$true] %s19_s24 }
   0x7   :  { %s331_s26 = smov 8   ;;  %s47_s1 = sshll.u32 %s377_s2, 4  ;;  %s48_s1 = int_to_ptr.hbm [resolvable:$true] %s47_s1 }
   0x8   :  { %25 = dma.hbm_to_vmem [thread:$0]  %s18_s22, 256, %s20_s24, [#allocation3], %s330_s25, %s330_s25, %s331_s26  }
   0x9   :  { %s332_s29 = smov [#allocation7]   ;;  %s63_s0 = sshll.u32 %s378_s3, 4  ;;  %s64_s0 = int_to_ptr.hbm [resolvable:$true] %s63_s0 }
   0xa   :  { %s49_s30 = sshll.u32 %s332_s29, 4  ;;  %s333_s7 = smov [#allocation8]   ;;  %s50_s30 = int_to_ptr.vmem [resolvable:$true] %s49_s30 }
   0xb   :  { %52 = dma.hbm_to_vmem [thread:$0]  %s48_s1, 128, %s50_s30, [#allocation6]  }
   0xc   :  { %s65_s8 = sshll.u32 %s333_s7, 4  ;;  %s66_s8 = int_to_ptr.vmem [resolvable:$true] %s65_s8 }
   0xd   :  { %68 = dma.hbm_to_vmem [thread:$0]  %s64_s0, 128, %s66_s8, [#allocation9]  }
   0xe   :  { %320 = dma.done.wait [#allocation3], 256  }
   0xf   :  { %321 = vsyncadd [#allocation3], 4294967040 }
  0x10   :  { %322 = dma.done.wait [#allocation6], 144  }
  0x11   :  { %323 = vsyncadd [#allocation6], 4294967152 }
  0x12   :  { %324 = dma.done.wait [#allocation9], 128  }
  0x13   :  { %325 = vsyncadd [#allocation9], 4294967168  ;;  %v99_v0 = vld [vmem:[#allocation2 + $0x8] sm:$0xff]  ;;  %v98_v1 = vld [vmem:[#allocation2] sm:$0xff]  ;;  %vm100_vm0 = vcmask 130048   ;;  %vm137_vm1 = vcmask 261120  }
  0x14   :  { %v97_v2 = vld [vmem:[#allocation8] sm:$0xff]  ;;  %118 = vmatpush.msra.mxu0 %v99_v0  ;;  %v199_v4 = vld [vmem:[#allocation5] ss:$0 sm:$0xff]  ;;  %v96_v9 = vld [vmem:[#allocation7] sm:$0xff]  ;;  %vm151_vm2 = vcmask 7168   ;;  %s334_s2 = smov [#allocation10]  }
  0x15   :  { %v124_v3 = vsel %vm100_vm0, %v97_v2, 0.0  ;;  %v145_v5 = vmul.f32 %v199_v4, %v97_v2  ;;  %v129_v11 = vmul.f32 %v96_v9, %v96_v9  ;;  %s170_s3 = sshll.u32 %s334_s2, 4  ;;  %s172_s11 = sshll.u32 %s379_s4, 4  ;;  %s171_s3 = int_to_ptr.vmem [resolvable:$true] %s170_s3  ;;  %s173_s11 = int_to_ptr.hbm [resolvable:$true] %s172_s11 }
  0x16   :  { %125 = vadd.xlane.f32.xlu0 %v124_v3  ;;  %119 = vmatpush.msra.mxu0 %v98_v1 }
  0x17   :  { %188 = vmatmul.msk.f32.vlgmr.msra.gmra.mxu0 %vm100_vm0, %v97_v2  ;;  %v146_v6 = vsel %vm100_vm0, %v145_v5, 0.0 }
  0x18   :  { %147 = vadd.xlane.f32.xlu1 %v146_v6 }
  0x89   :  { %v126_v7 = vpop.xlane.xlu0 %125 }
  0x8a   :  { %v127_v8 = vmul.f32 0.5, %v126_v7 }
  0x8b   :  { %v148_v21 = vpop.xlane.xlu1 %147 }
  0x8c   :  { %v128_v10 = vadd.f32 0.5, %v127_v8 }
  0x8e   :  { %v130_v13 = vmul.f32 %v129_v11, %v128_v10 }
  0x94   :  { %v121_v12 = vpop.f32.mrf.mxu0 }
  0x95   :  { %v131_v14 = vmul.f32 %v121_v12, %v121_v12  ;;  %v134_v15 = vmul.f32 %v121_v12, %v96_v9 }
  0x97   :  { %v132_v16 = vmul.f32 0.5, %v131_v14  ;;  %v135_v18 = vmul.f32 2.0, %v134_v15 }
  0x99   :  { %v133_v17 = vadd.f32 %v132_v16, %v130_v13 }
  0x9b   :  { %v136_v19 = vsub.f32 %v133_v17, %v135_v18 }
  0x9d   :  { %v138_v20 = vsel %vm137_vm1, %v136_v19, 0.0 }
  0x9e   :  { %139 = vadd.xlane.f32.xlu0 %v138_v20 }
 0x111   :  { %v140_v22 = vpop.xlane.xlu0 %139 }
 0x112   :  { %v150_v23 = vadd.f32 %v148_v21, %v140_v22 }
 0x114   :  { %v152_v24 = vsel %vm151_vm2, %v150_v23, 0.0 }
 0x115   :  { %153 = vadd.xlane.f32.xlu1 %v152_v24 }
 0x188   :  { %v154_v25 = vpop.xlane.xlu1 %153 }
 0x189   :  { %v155_v26 = vrot.slane %v154_v25, 4 }
 0x18b   :  { %v156_v27 = vadd.f32 %v155_v26, %v154_v25 }
 0x18d   :  { %v157_v28 = vrot.slane %v156_v27, 2 }
 0x18f   :  { %v158_v29 = vadd.f32 %v157_v28, %v156_v27 }
 0x191   :  { %v159_v30 = vrot.slane %v158_v29, 1 }
 0x193   :  { %v160_v31 = vadd.f32 %v159_v30, %v158_v29 }
 0x195   :  { %189 = vpush %v160_v31 }
 0x1c6   :  { %s190_s12 = spop %189 }
 0x1c7   :  { %v162_v32 = vstv %s190_s12 }
 0x1c8   :  { %164 = vst [vmem:[#allocation10] sm:$0xff] %v162_v32 }
 0x1c9   :  { %175 = dma.vmem_to_hbm [thread:$0]  %s171_s3, 128, %s173_s11, [#allocation4]  }
 0x1ca   :  { %326 = dma.done.wait [#allocation4], 128  }
 0x1cb   :  { %327 = vsyncadd [#allocation4], 4294967168 }
 0x1cc   :  { %180 = vsyncpa [#allocation3], 1 }
 0x1cd   :  { %181 = vsyncpa [#allocation6], 1 }
 0x1ce   :  { %182 = vsyncpa [#allocation9], 1 }
 0x1cf   :  { %183 = vsyncpa [#allocation4], 1 }

</bundles_post_ra>
